<compile_context>
chip_gen: v7x
topology: tpu7x:2x2x1
jax: 0.10.0
libtpu: 0.0.40
codegen_flags: <defaults>
</compile_context>

<pallas_src>
import jax
import jax.numpy as jnp
from jax.experimental import pallas as pl
from jax.experimental.pallas import tpu as pltpu


_MAX_TB = 8192            # upper bound on batch-tile rows per grid step
_VMEM_BUDGET = 20 << 20   # conservative per-step working-set budget (bytes)


def _cdiv(a, b):
    return (a + b - 1) // b


def _round_up(a, m):
    return _cdiv(a, m) * m


def _choose_tile_b(batch, feat):
    """Batch-tile rows per grid step: as large as the VMEM budget allows,
    balanced across tiles, multiple of 8, and >=2 tiles when batch >= 256
    (so both v7x TensorCores get work)."""
    f_pad = _round_up(feat, 128)
    x_bufs = 3 if feat >= 1024 else 2       # deeper x pipeline for big F
    # Conservative per-row VMEM bytes: pipelined f32 x tiles (lane-padded)
    # + f32/bf16 intermediates + narrow (rows, 1) output blocks.
    per_row = x_bufs * 4 * f_pad + 4096
    fixed = 512 * f_pad + (1 << 20)         # resident weights + slack
    cap = max(8, min(_MAX_TB, (_VMEM_BUDGET - fixed) // per_row))
    cap = max(8, (cap // 8) * 8)
    if batch >= 256:
        # Guarantee >=2 balanced tiles so v7x's two TensorCores both get work.
        cap = min(cap, _round_up(_cdiv(batch, 2), 8))
    if batch <= cap:
        return batch                        # single exact block (any B works)
    n = _cdiv(batch, cap)                   # fewest tiles within the cap
    return min(cap, _round_up(_cdiv(batch, n), 8))


def _mlp_sigmoid_kernel(x_ref,             # (TB, F)    f32 (pipelined tiles)
                        w1_ref, b1_ref,    # (F, 128)   bf16 ; (1, 128) f32
                        w2_ref, b2_ref,    # (128, 64)  bf16 ; (1, 64)  f32
                        w3_ref, b3_ref,    # (64, 32)   bf16 ; (1, 32)  f32
                        w4_ref,            # (1, 32)    f32 (VPU head weight)
                        b4_ref,            # (1,)       f32 in SMEM
                        o_ref):            # (TB, 1)    f32
    # Cast the x tile to bf16 here (not in the wrapper): the VPU pack hides
    # under the MXU work / the DMA of the next tile.
    x = x_ref[...].astype(jnp.bfloat16)

    # fc1 + ReLU  (bf16 MXU operands, f32 accumulation)
    h1 = jnp.dot(x, w1_ref[...], preferred_element_type=jnp.float32)
    h1 = jnp.maximum(h1 + b1_ref[...], 0.0)

    # fc2 + ReLU
    h2 = jnp.dot(h1.astype(jnp.bfloat16), w2_ref[...],
                 preferred_element_type=jnp.float32)
    h2 = jnp.maximum(h2 + b2_ref[...], 0.0)

    # fc3 + ReLU
    h3 = jnp.dot(h2.astype(jnp.bfloat16), w3_ref[...],
                 preferred_element_type=jnp.float32)
    h3 = jnp.maximum(h3 + b3_ref[...], 0.0)

    # Head (32 -> 1): VPU multiply + 32-lane reduce instead of an M=1 MXU
    # matmul (no MXU launch, no hidden transpose of h3). Row-local, so ragged
    # last-block garbage rows cannot contaminate valid rows.
    z = jnp.sum(h3 * w4_ref[...], axis=-1, keepdims=True) + b4_ref[0]  # (TB,1)

    # sigmoid via exp + divide (EUP); exact limits for large |z|.
    o_ref[...] = 1.0 / (1.0 + jnp.exp(-z))


def mlp_sigmoid_head(x, params):
    """x: (B, input_size) f32.  params: dict w1,b1,...,w4,b4.  -> (B, 1) f32."""
    B, F = x.shape
    tile_b = _choose_tile_b(B, F)
    num_tiles = _cdiv(B, tile_b)

    # bf16 MXU operands for the hidden layers (tiny arrays, negligible cost);
    # the head weight stays f32 since it is applied on the VPU.
    w1 = params["w1"].astype(jnp.bfloat16)
    w2 = params["w2"].astype(jnp.bfloat16)
    w3 = params["w3"].astype(jnp.bfloat16)
    w4 = params["w4"].reshape(1, -1).astype(jnp.float32)     # (1, 32)
    b1 = params["b1"].astype(jnp.float32)                    # (1, 128)
    b2 = params["b2"].astype(jnp.float32)                    # (1, 64)
    b3 = params["b3"].astype(jnp.float32)                    # (1, 32)
    b4 = params["b4"].reshape(-1).astype(jnp.float32)        # (1,) SMEM scalar

    def resident(arr):
        # Whole array as one block + constant index map -> stays resident in
        # VMEM across all grid iterations (no per-step re-DMA).
        zeros = (0,) * arr.ndim
        return pl.BlockSpec(arr.shape, lambda i: zeros)

    if F >= 1024:
        # Deeper input pipeline where x dominates HBM traffic (v5e tips
        # DMA-bound first); extra buffer is accounted for in _choose_tile_b.
        x_spec = pl.BlockSpec((tile_b, F), lambda i: (i, 0),
                              pipeline_mode=pl.Buffered(3))
    else:
        x_spec = pl.BlockSpec((tile_b, F), lambda i: (i, 0))

    out = pl.pallas_call(
        _mlp_sigmoid_kernel,
        out_shape=jax.ShapeDtypeStruct((B, 1), jnp.float32),
        grid=(num_tiles,),
        in_specs=[
            x_spec,
            resident(w1), resident(b1),
            resident(w2), resident(b2),
            resident(w3), resident(b3),
            resident(w4),
            pl.BlockSpec(memory_space=pltpu.MemorySpace.SMEM),   # b4 scalar
        ],
        out_specs=pl.BlockSpec((tile_b, 1), lambda i: (i, 0)),
        compiler_params=pltpu.CompilerParams(
            dimension_semantics=("parallel",),     # megacore split on v7x
            vmem_limit_bytes=32 << 20),
    )(x, w1, b1, w2, b2, w3, b3, w4, b4)
    return out


def init_params(key, input_size):
    """Deterministic init matching nn.Linear shapes (weights stored transposed)."""
    dims = [(input_size, 128), (128, 64), (64, 32), (32, 1)]
    params = {}
    for i, (fan_in, fan_out) in enumerate(dims, start=1):
        key, kw, kb = jax.random.split(key, 3)
        bound = 1.0 / jnp.sqrt(jnp.float32(fan_in))
        # PyTorch nn.Linear default: U(-1/sqrt(fan_in), 1/sqrt(fan_in))
        params[f"w{i}"] = jax.random.uniform(
            kw, (fan_in, fan_out), jnp.float32, minval=-bound, maxval=bound)
        params[f"b{i}"] = jax.random.uniform(
            kb, (1, fan_out), jnp.float32, minval=-bound, maxval=bound)
    return params


def reference_forward(x, params):
    h = jnp.maximum(x @ params["w1"] + params["b1"], 0.0)
    h = jnp.maximum(h @ params["w2"] + params["b2"], 0.0)
    h = jnp.maximum(h @ params["w3"] + params["b3"], 0.0)
    return jax.nn.sigmoid(h @ params["w4"] + params["b4"])


if __name__ == "__main__":
    key = jax.random.PRNGKey(0)
    key, kx1, kx2 = jax.random.split(key, 3)

    input_size = 32
    params = init_params(key, input_size)

    # Small single-tile case.
    x1 = jax.random.normal(kx1, (8, input_size), jnp.float32)
    out1 = jax.block_until_ready(mlp_sigmoid_head(x1, params))
    ref1 = reference_forward(x1, params)
    assert out1.shape == (8, 1), out1.shape
    assert jnp.allclose(out1, ref1, atol=2e-2, rtol=2e-2), (out1, ref1)

    # Multi-tile case with a ragged last block (exercises the pipelined grid
    # path and the pad-free boundary handling).
    x2 = jax.random.normal(kx2, (300, input_size), jnp.float32)
    out2 = jax.block_until_ready(mlp_sigmoid_head(x2, params))
    ref2 = reference_forward(x2, params)
    assert out2.shape == (300, 1), out2.shape
    assert jnp.allclose(out2, ref2, atol=2e-2, rtol=2e-2), (out2, ref2)

    print("KERNEL_OK")
</pallas_src>

<mosaic_0001>
module attributes {stable_mosaic.version = 11 : i64} {
  func.func @_mlp_sigmoid_kernel(%arg0: i32, %arg1: memref<8x32xf32, #tpu.memory_space<vmem>>, %arg2: memref<32x128xbf16, #tpu.memory_space<vmem>>, %arg3: memref<1x128xf32, #tpu.memory_space<vmem>>, %arg4: memref<128x64xbf16, #tpu.memory_space<vmem>>, %arg5: memref<1x64xf32, #tpu.memory_space<vmem>>, %arg6: memref<64x32xbf16, #tpu.memory_space<vmem>>, %arg7: memref<1x32xf32, #tpu.memory_space<vmem>>, %arg8: memref<1x32xf32, #tpu.memory_space<vmem>>, %arg9: memref<1xf32, #tpu.memory_space<smem>>, %arg10: memref<8x1xf32, #tpu.memory_space<vmem>>) attributes {dimension_semantics = [#tpu.dimension_semantics<parallel>], iteration_bounds = array<i64: 1>, scalar_prefetch = 0 : i64, scratch_operands = 0 : i64, tpu.core_type = #tpu.core_type<tc>, window_params = [{transform_indices = @transform_0, window_bounds = array<i64: 8, 32>}, {pipeline_mode = #tpu.pipeline_mode<synchronous>, transform_indices = @transform_1, window_bounds = array<i64: 32, 128>}, {pipeline_mode = #tpu.pipeline_mode<synchronous>, transform_indices = @transform_2, window_bounds = array<i64: 1, 128>}, {pipeline_mode = #tpu.pipeline_mode<synchronous>, transform_indices = @transform_3, window_bounds = array<i64: 128, 64>}, {pipeline_mode = #tpu.pipeline_mode<synchronous>, transform_indices = @transform_4, window_bounds = array<i64: 1, 64>}, {pipeline_mode = #tpu.pipeline_mode<synchronous>, transform_indices = @transform_5, window_bounds = array<i64: 64, 32>}, {pipeline_mode = #tpu.pipeline_mode<synchronous>, transform_indices = @transform_6, window_bounds = array<i64: 1, 32>}, {pipeline_mode = #tpu.pipeline_mode<synchronous>, transform_indices = @transform_7, window_bounds = array<i64: 1, 32>}, {transform_indices = @transform_8, window_bounds = array<i64: 1>}, {transform_indices = @transform_9, window_bounds = array<i64: 8, 1>}]} {
    %c0 = arith.constant 0 : index
    %c0_0 = arith.constant 0 : index
    %0 = vector.load %arg1[%c0, %c0_0] : memref<8x32xf32, #tpu.memory_space<vmem>>, vector<8x32xf32>
    %1 = arith.truncf %0 : vector<8x32xf32> to vector<8x32xbf16>
    %c0_1 = arith.constant 0 : index
    %c0_2 = arith.constant 0 : index
    %2 = vector.load %arg2[%c0_1, %c0_2] : memref<32x128xbf16, #tpu.memory_space<vmem>>, vector<32x128xbf16>
    %cst = arith.constant dense<0.000000e+00> : vector<8x128xf32>
    %3 = tpu.matmul %1, %2, %cst {dimension_numbers = #tpu.dot_dimension_numbers<[1], [0], [0], [1], [0, 0, 1, 1], [], []>} : vector<8x32xbf16>, vector<32x128xbf16>, vector<8x128xf32> -> vector<8x128xf32>
    %c0_3 = arith.constant 0 : index
    %c0_4 = arith.constant 0 : index
    %4 = vector.load %arg3[%c0_3, %c0_4] : memref<1x128xf32, #tpu.memory_space<vmem>>, vector<1x128xf32>
    %5 = vector.broadcast %4 : vector<1x128xf32> to vector<8x128xf32>
    %6 = arith.addf %3, %5 : vector<8x128xf32>
    %cst_5 = arith.constant 0.000000e+00 : f32
    %7 = vector.broadcast %cst_5 : f32 to vector<8x128xf32>
    %8 = arith.maximumf %6, %7 : vector<8x128xf32>
    %9 = arith.truncf %8 : vector<8x128xf32> to vector<8x128xbf16>
    %c0_6 = arith.constant 0 : index
    %c0_7 = arith.constant 0 : index
    %10 = vector.load %arg4[%c0_6, %c0_7] : memref<128x64xbf16, #tpu.memory_space<vmem>>, vector<128x64xbf16>
    %cst_8 = arith.constant dense<0.000000e+00> : vector<8x64xf32>
    %11 = tpu.matmul %9, %10, %cst_8 {dimension_numbers = #tpu.dot_dimension_numbers<[1], [0], [0], [1], [0, 0, 1, 1], [], []>} : vector<8x128xbf16>, vector<128x64xbf16>, vector<8x64xf32> -> vector<8x64xf32>
    %c0_9 = arith.constant 0 : index
    %c0_10 = arith.constant 0 : index
    %12 = vector.load %arg5[%c0_9, %c0_10] : memref<1x64xf32, #tpu.memory_space<vmem>>, vector<1x64xf32>
    %13 = vector.broadcast %12 : vector<1x64xf32> to vector<8x64xf32>
    %14 = arith.addf %11, %13 : vector<8x64xf32>
    %cst_11 = arith.constant 0.000000e+00 : f32
    %15 = vector.broadcast %cst_11 : f32 to vector<8x64xf32>
    %16 = arith.maximumf %14, %15 : vector<8x64xf32>
    %17 = arith.truncf %16 : vector<8x64xf32> to vector<8x64xbf16>
    %c0_12 = arith.constant 0 : index
    %c0_13 = arith.constant 0 : index
    %18 = vector.load %arg6[%c0_12, %c0_13] : memref<64x32xbf16, #tpu.memory_space<vmem>>, vector<64x32xbf16>
    %cst_14 = arith.constant dense<0.000000e+00> : vector<8x32xf32>
    %19 = tpu.matmul %17, %18, %cst_14 {dimension_numbers = #tpu.dot_dimension_numbers<[1], [0], [0], [1], [0, 0, 1, 1], [], []>} : vector<8x64xbf16>, vector<64x32xbf16>, vector<8x32xf32> -> vector<8x32xf32>
    %c0_15 = arith.constant 0 : index
    %c0_16 = arith.constant 0 : index
    %20 = vector.load %arg7[%c0_15, %c0_16] : memref<1x32xf32, #tpu.memory_space<vmem>>, vector<1x32xf32>
    %21 = vector.broadcast %20 : vector<1x32xf32> to vector<8x32xf32>
    %22 = arith.addf %19, %21 : vector<8x32xf32>
    %cst_17 = arith.constant 0.000000e+00 : f32
    %23 = vector.broadcast %cst_17 : f32 to vector<8x32xf32>
    %24 = arith.maximumf %22, %23 : vector<8x32xf32>
    %c0_18 = arith.constant 0 : index
    %c0_19 = arith.constant 0 : index
    %25 = vector.load %arg8[%c0_18, %c0_19] : memref<1x32xf32, #tpu.memory_space<vmem>>, vector<1x32xf32>
    %26 = vector.broadcast %25 : vector<1x32xf32> to vector<8x32xf32>
    %27 = arith.mulf %24, %26 : vector<8x32xf32>
    %cst_20 = arith.constant dense<0.000000e+00> : vector<8xf32>
    %28 = vector.multi_reduction <add>, %27, %cst_20 [1] : vector<8x32xf32> to vector<8xf32>
    %29 = vector.shape_cast %28 : vector<8xf32> to vector<8x1xf32>
    %c0_21 = arith.constant 0 : index
    %30 = memref.load %arg9[%c0_21] : memref<1xf32, #tpu.memory_space<smem>>
    %31 = vector.broadcast %30 : f32 to vector<8x1xf32>
    %32 = arith.addf %29, %31 : vector<8x1xf32>
    %cst_22 = arith.constant 0.000000e+00 : f32
    %33 = vector.broadcast %cst_22 : f32 to vector<8x1xf32>
    %34 = arith.subf %33, %32 : vector<8x1xf32>
    %35 = math.exp %34 : vector<8x1xf32>
    %cst_23 = arith.constant 1.000000e+00 : f32
    %36 = vector.broadcast %cst_23 : f32 to vector<8x1xf32>
    %37 = arith.addf %36, %35 : vector<8x1xf32>
    %cst_24 = arith.constant 1.000000e+00 : f32
    %38 = vector.broadcast %cst_24 : f32 to vector<8x1xf32>
    %39 = arith.divf %38, %37 : vector<8x1xf32>
    %c0_25 = arith.constant 0 : index
    %c0_26 = arith.constant 0 : index
    %40 = vector.load %arg10[%c0_25, %c0_26] : memref<8x1xf32, #tpu.memory_space<vmem>>, vector<8x1xf32>
    tpu.vector_store %arg10[%c0_25, %c0_26], %39 {strides = array<i32>} : memref<8x1xf32, #tpu.memory_space<vmem>>, vector<8x1xf32>,
    return
  }
  func.func @transform_0(%arg0: i32) -> (i32, i32) {
    %c0_i32 = arith.constant 0 : i32
    %c0_i32_0 = arith.constant 0 : i32
    return %arg0, %c0_i32 : i32, i32
  }
  func.func @transform_1(%arg0: i32) -> (i32, i32) {
    %c0_i32 = arith.constant 0 : i32
    %c0_i32_0 = arith.constant 0 : i32
    %c0_i32_1 = arith.constant 0 : i32
    return %c0_i32, %c0_i32_0 : i32, i32
  }
  func.func @transform_2(%arg0: i32) -> (i32, i32) {
    %c0_i32 = arith.constant 0 : i32
    %c0_i32_0 = arith.constant 0 : i32
    %c0_i32_1 = arith.constant 0 : i32
    return %c0_i32, %c0_i32_0 : i32, i32
  }
  func.func @transform_3(%arg0: i32) -> (i32, i32) {
    %c0_i32 = arith.constant 0 : i32
    %c0_i32_0 = arith.constant 0 : i32
    %c0_i32_1 = arith.constant 0 : i32
    return %c0_i32, %c0_i32_0 : i32, i32
  }
  func.func @transform_4(%arg0: i32) -> (i32, i32) {
    %c0_i32 = arith.constant 0 : i32
    %c0_i32_0 = arith.constant 0 : i32
    %c0_i32_1 = arith.constant 0 : i32
    return %c0_i32, %c0_i32_0 : i32, i32
  }
  func.func @transform_5(%arg0: i32) -> (i32, i32) {
    %c0_i32 = arith.constant 0 : i32
    %c0_i32_0 = arith.constant 0 : i32
    %c0_i32_1 = arith.constant 0 : i32
    return %c0_i32, %c0_i32_0 : i32, i32
  }
  func.func @transform_6(%arg0: i32) -> (i32, i32) {
    %c0_i32 = arith.constant 0 : i32
    %c0_i32_0 = arith.constant 0 : i32
    %c0_i32_1 = arith.constant 0 : i32
    return %c0_i32, %c0_i32_0 : i32, i32
  }
  func.func @transform_7(%arg0: i32) -> (i32, i32) {
    %c0_i32 = arith.constant 0 : i32
    %c0_i32_0 = arith.constant 0 : i32
    %c0_i32_1 = arith.constant 0 : i32
    return %c0_i32, %c0_i32_0 : i32, i32
  }
  func.func @transform_8(%arg0: i32) -> i32 {
    %c0_i32 = arith.constant 0 : i32
    %c0_i32_0 = arith.constant 0 : i32
    return %c0_i32 : i32
  }
  func.func @transform_9(%arg0: i32) -> (i32, i32) {
    %c0_i32 = arith.constant 0 : i32
    %c0_i32_0 = arith.constant 0 : i32
    return %arg0, %c0_i32 : i32, i32
  }
}

</mosaic_0001>

<bundles_post_ra>
// kernel: tpu_custom_call.1
= control target key start
LH: loop header
LB: loop body
LE: loop exit
PB: predicated region body
PF: predicated region fallthrough
CT: control target
= control target key end

     0   :  { %v425_v0 = vmov 0.0   ;;  %vm426_vm0 = vmmov 0   ;;  %vm59_vm1 = vcmask 261120   ;;  %vm257_vm2 = vcmask 523264   ;;  %s545_s1 = inlined_call_operand.vmem [shape: bf16[32,128], index: 1, kind: input, shape index: {}]   ;;  %s546_s0 = inlined_call_operand.vmem [shape: f32[8,32], index: 0, kind: input, shape index: {}]   ;;  %s547_s3 = inlined_call_operand.vmem [shape: bf16[128,64], index: 3, kind: input, shape index: {}]   ;;  %s548_s5 = inlined_call_operand.vmem [shape: bf16[64,32], index: 5, kind: input, shape index: {}]   ;;  %s549_s2 = inlined_call_operand.vmem [shape: f32[1,128], index: 2, kind: input, shape index: {}]   ;;  %s550_s4 = inlined_call_operand.vmem [shape: f32[1,64], index: 4, kind: input, shape index: {}]   ;;  %s551_s6 = inlined_call_operand.vmem [shape: f32[1,32], index: 6, kind: input, shape index: {}]   ;;  %s552_s7 = inlined_call_operand.vmem [shape: f32[1,32], index: 7, kind: input, shape index: {}]   ;;  %s553_s8 = inlined_call_operand.<no memory space> [shape: f32[1], index: 8, kind: input, shape index: {}]   ;;  %s554_s9 = inlined_call_operand.vmem [shape: f32[8,1], index: 9, kind: output, shape index: {}]  }
   0x1   :  { %365 = vmatprep.subr.bf16.mxu0 %v425_v0  ;;  %v407_v1 = vld [vmem:[%s545_s1] sm:$0xff]   ;;  %369 = vmatprep.mubr.msk.bf16.mxu0 %vm426_vm0, %v425_v0  ;;  %v408_v2 = vld [vmem:[%s545_s1 + $0x8] sm:$0xff]   ;;  %v411_v7 = vld [vmem:[%s547_s3 + $0x10] sm:$0xff]   ;;  %v314_v43 = vstv %s553_s8  ;;  %vm322_vm3 = vcmask 7168  }
   0x2   :  { %373 = vmatprep.subr.bf16.mxu1 %v425_v0  ;;  %389 = vmatprep.mubr.msk.bf16.mxu1 %vm426_vm0, %v425_v0  ;;  %v34_v3 = vld [vmem:[%s546_s0] sm:$0xff]  ;;  %v410_v6 = vld [vmem:[%s547_s3 + $0x8] sm:$0xff]   ;;  %v412_v8 = vld [vmem:[%s547_s3 + $0x18] sm:$0xff]  }
   0x3   :  { %366 = vmatpush3.bf16.msra.mxu0 %v407_v1  ;;  %v409_v4 = vld [vmem:[%s547_s3] sm:$0xff]   ;;  %v35_v5 = vpack.c.bf16 %v34_v3, %v34_v3  ;;  %v414_v10 = vld [vmem:[%s547_s3 + $0x28] sm:$0xff]   ;;  %v415_v11 = vld [vmem:[%s547_s3 + $0x30] sm:$0xff]  }
   0x4   :  { %367 = vmatprep.subr.bf16.mxu0 %v425_v0  ;;  %374 = vmatpush3.bf16.msra.mxu1 %v409_v4  ;;  %v413_v9 = vld [vmem:[%s547_s3 + $0x20] sm:$0xff]   ;;  %v416_v12 = vld [vmem:[%s547_s3 + $0x38] sm:$0xff]   ;;  %v418_v14 = vld [vmem:[%s548_s5 + $0x8] sm:$0xff]  }
   0x5   :  { %375 = vmatprep.subr.bf16.mxu1 %v425_v0  ;;  %v417_v13 = vld [vmem:[%s548_s5] sm:$0xff]   ;;  %v419_v23 = vld [vmem:[%s548_s5 + $0x10] sm:$0xff]   ;;  %v420_v24 = vld [vmem:[%s548_s5 + $0x18] sm:$0xff]  }
   0x6   :  { %v328_v15 = vld [vmem:[%s549_s2] ss:$0 sm:$0xff] }
   0x7   :  { %368 = vmatpush3.bf16.msra.mxu0 %v408_v2  ;;  %v332_v25 = vld [vmem:[%s550_s4] ss:$0 sm:$0xff] }
   0x8   :  { %393 = vmatprep.subr.bf16.mxu0 %v425_v0  ;;  %376 = vmatpush3.bf16.msra.mxu1 %v410_v6  ;;  %v341_v33 = vld [vmem:[%s551_s6] ss:$0 sm:$0xff] }
   0x9   :  { %377 = vmatprep.subr.bf16.mxu1 %v425_v0  ;;  %v347_v38 = vld [vmem:[%s552_s7] ss:$0 sm:$0xff] }
   0xa   :  { %370 = vmatmul.mubr.msk.bf16.vlgmr.msra.gmra.mrb[0].mxu0 %vm59_vm1, %v35_v5 }
   0xb   :  { %401 = vmatprep.mubr.msk.bf16.mxu0 %vm426_vm0, %v425_v0  ;;  %394 = vmatpush3.bf16.msra.mxu0 %v417_v13 }
   0xc   :  { %378 = vmatpush3.bf16.msra.mxu1 %v411_v7  ;;  %395 = vmatprep.subr.bf16.mxu0 %v425_v0 }
   0xd   :  { %379 = vmatprep.subr.bf16.mxu1 %v425_v0 }
   0xf   :  { %396 = vmatpush3.bf16.msra.mxu0 %v418_v14 }
  0x10   :  { %380 = vmatpush3.bf16.msra.mxu1 %v412_v8  ;;  %397 = vmatprep.subr.bf16.mxu0 %v425_v0 }
  0x11   :  { %381 = vmatprep.subr.bf16.mxu1 %v425_v0 }
  0x13   :  { %398 = vmatpush3.bf16.msra.mxu0 %v419_v23 }
  0x14   :  { %382 = vmatpush3.bf16.msra.mxu1 %v413_v9  ;;  %399 = vmatprep.subr.bf16.mxu0 %v425_v0 }
  0x15   :  { %383 = vmatprep.subr.bf16.mxu1 %v425_v0 }
  0x17   :  { %400 = vmatpush3.bf16.msra.mxu0 %v420_v24 }
  0x18   :  { %384 = vmatpush3.bf16.msra.mxu1 %v414_v10 }
  0x19   :  { %385 = vmatprep.subr.bf16.mxu1 %v425_v0 }
  0x1c   :  { %386 = vmatpush3.bf16.msra.mxu1 %v415_v11 }
  0x1d   :  { %387 = vmatprep.subr.bf16.mxu1 %v425_v0 }
  0x20   :  { %388 = vmatpush3.bf16.msra.mxu1 %v416_v12 }
  0xdd   :  { %v97_v16 = vpop.f32.mrb[0].mxu0 }
  0xde   :  { %v98_v17 = vadd.f32 %v328_v15, %v97_v16  ;;  %v371_v18 = vpop.f32.mrb[1].mxu0 }
  0xdf   :  { %v100_v19 = vpop.f32.mrb[2].mxu0 }
  0xe0   :  { %v103_v20 = vmax.f32 %v98_v17, 0.0  ;;  %v372_v21 = vpop.f32.mrb[3].mxu0 }
  0xe2   :  { %v104_v22 = vpack.c.bf16 %v103_v20, %v103_v20 }
  0xe4   :  { %390 = vmatmul.mubr.bf16.vlgmr.msra.gmra.mrb[0].mxu1 %v104_v22 }
 0x1b7   :  { %v210_v26 = vpop.f32.mrb[0].mxu1 }
 0x1b8   :  { %v211_v27 = vadd.f32 %v332_v25, %v210_v26  ;;  %v391_v28 = vpop.f32.mrb[1].mxu1 }
 0x1b9   :  { %v213_v29 = vpop.f32.mrb[2].mxu1 }
 0x1ba   :  { %v216_v30 = vmax.f32 %v211_v27, 0.0  ;;  %v392_v31 = vpop.f32.mrb[3].mxu1 }
 0x1bc   :  { %v217_v32 = vpack.c.bf16 %v216_v30, %v216_v30 }
 0x1be   :  { %402 = vmatmul.mubr.msk.bf16.vlgmr.msra.gmra.mrb[4].mxu0 %vm257_vm2, %v217_v32 }
 0x291   :  { %v295_v34 = vpop.f32.mrb[4].mxu0 }
 0x292   :  { %v296_v35 = vadd.f32 %v341_v33, %v295_v34  ;;  %v403_v36 = vpop.f32.mrb[5].mxu0 }
 0x293   :  { %v298_v37 = vpop.f32.mrb[6].mxu0 }
 0x294   :  { %v301_v39 = vmax.f32 %v296_v35, 0.0  ;;  %v404_v40 = vpop.f32.mrb[7].mxu0 }
 0x296   :  { %v309_v41 = vmul.f32 %v347_v38, %v301_v39 }
 0x298   :  { %v310_v42 = vsel %vm59_vm1, %v309_v41, 0.0 }
 0x299   :  { %311 = vadd.xlane.f32.xlu0 %v310_v42 }
 0x326   :  { %v312_v44 = vpop.xlane.xlu0 %311 }
 0x327   :  { %v315_v45 = vadd.f32 %v314_v43, %v312_v44 }
 0x329   :  { %v316_v46 = vsub.f32 0.0, %v315_v45 }
 0x32b   :  { %v317_v47 = vmul.f32 1.442695, %v316_v46 }
 0x32d   :  { %421 = vpow2.f32 %v317_v47 }
 0x337   :  { %v422_v48 = vpop.eup %421 }
 0x338   :  { %v319_v49 = vadd.f32 1.0, %v422_v48 }
 0x33a   :  { %423 = vrcp.f32 %v319_v49 }
 0x344   :  { %v424_v50 = vpop.eup %423 }
 0x345   :  { %323 = vst.msk [vmem:[%s554_s9] sm:$0xff] %vm322_vm3, %v424_v50 }

</bundles_post_ra>
